<compile_context>
chip_gen: v7x
topology: tpu7x:2x2x1
jax: 0.10.0
libtpu: 0.0.40
codegen_flags: <defaults>
</compile_context>

<pallas_src>
import functools

import jax
import jax.numpy as jnp
from jax.experimental import pallas as pl
from jax.experimental.pallas import tpu as pltpu


_LANE = 128                        # lane width (last-dim alignment)
_N_TILE_ALIGN = 256                # v6e/v7x MXU is 2x256x256: N tiles in 256s
_VMEM_BUDGET = 40 * 1024 * 1024    # tile budget, headroom under v7x 64 MiB/TC
_VMEM_LIMIT = 48 * 1024 * 1024


def _round_up(x, m):
    return ((x + m - 1) // m) * m


def _sublane_align(dtype):
    # Sub-32-bit dtypes pack along sublanes: (8,128) f32, (16,128) bf16, (32,128) 8-bit.
    return max(8, 32 // jnp.dtype(dtype).itemsize)


def _tile_plan(K, N, *, tn, tk):
    """Batch-independent tile plan for the weight (so weights can be prepped once)."""
    tn = min(tn, _round_up(N, _N_TILE_ALIGN))
    tk = min(tk, _round_up(K, _LANE))
    # Megacore (v7x has 2 TCs): if N would give a single output block but is big
    # enough, halve tn so the parallel grid axes have >=2 blocks to shard.
    if _round_up(N, tn) == tn and tn >= 2 * _N_TILE_ALIGN:
        tn //= 2
    Kp = _round_up(K, tk)
    Np = _round_up(N, tn)
    return tn, tk, Kp, Np


# ---------------------------------------------------------------------------
# Kernels
# ---------------------------------------------------------------------------

def _linear_fullk_kernel(x_ref, w_ref, b_ref, o_ref):
    # Single K block: dot straight into the output tile. No accumulator RMW,
    # no pl.when branches, single cast.  Weight already in (K, N) layout.
    acc = jnp.dot(x_ref[...], w_ref[...], preferred_element_type=jnp.float32)
    o_ref[...] = (acc + b_ref[...]).astype(o_ref.dtype)


def _linear_ktiled_kernel(x_ref, w_ref, b_ref, o_ref, acc_ref):
    k = pl.program_id(2)

    @pl.when(k == 0)
    def _init():
        # Fold the bias into the accumulator init; bias block is k-resident.
        acc_ref[...] = jnp.broadcast_to(b_ref[...], acc_ref.shape)

    # x tile (tm, tk) @ w tile (tk, tn): K on sublanes / N on lanes, f32 accum.
    acc_ref[...] += jnp.dot(x_ref[...], w_ref[...],
                            preferred_element_type=jnp.float32)

    @pl.when(k == pl.num_programs(2) - 1)
    def _store():
        o_ref[...] = acc_ref[...].astype(o_ref.dtype)


# ---------------------------------------------------------------------------
# Parameter prep (call once at weight-load time, NOT per forward call)
# ---------------------------------------------------------------------------

def prepare_linear_params(weight, bias, *, tn=512, tk=1024, mxu_dtype=None):
    """One-time prep of PyTorch-layout weights for the Pallas GEMM.

    * transpose (out, in) -> (in, out) = (K, N): MXU sees K on sublanes, N on
      lanes, so the kernel needs no transpose,
    * optional cast to mxu_dtype (bf16 recommended on v5e/v6e/v7x; fp8 such as
      jnp.float8_e4m3fn on v7x),
    * zero-pad K/N to the tile plan (keeps the contraction exact and makes the
      per-call weight-side pads no-ops).

    Returns (wT, bias2d, plan) to pass to linear_fc_prepared.
    """
    N, K = weight.shape
    assert bias.shape == (N,)
    tn, tk, Kp, Np = _tile_plan(K, N, tn=tn, tk=tk)
    if mxu_dtype is not None:
        weight = weight.astype(mxu_dtype)
    wT = weight.T                                      # (K, N)
    if (Kp, Np) != (K, N):
        wT = jnp.pad(wT, ((0, Kp - K), (0, Np - N)))
    b2d = jnp.pad(bias.astype(jnp.float32), (0, Np - N)).reshape(1, Np)
    return wT, b2d, (N, tn, tk)


# ---------------------------------------------------------------------------
# Forward
# ---------------------------------------------------------------------------

@functools.partial(jax.jit, static_argnames=("plan", "tm", "mxu_dtype"))
def linear_fc_prepared(x, wT, b2d, *, plan, tm=512, mxu_dtype=None):
    """y = x @ W.T + b, given weights pre-processed by prepare_linear_params."""
    N, tn, tk = plan
    Kp, Np = wT.shape
    B, K = x.shape
    assert K <= Kp and N <= Np

    out_dtype = x.dtype
    if mxu_dtype is not None:
        x = x.astype(mxu_dtype)

    in_itemsize = jnp.dtype(x.dtype).itemsize
    out_itemsize = jnp.dtype(out_dtype).itemsize

    m_al = _sublane_align(x.dtype)
    tm = min(tm, _round_up(B, m_al))

    # VMEM budget check (v7x has only 64 MiB/TC): double-buffered input tiles +
    # double-buffered output tile + f32 accumulator (only when K is tiled).
    def vmem_bytes(tm_, tn_, tk_):
        kt_ = Kp // tk_
        return (2 * (tm_ * tk_ + tk_ * tn_) * in_itemsize
                + 2 * tm_ * tn_ * out_itemsize
                + (tm_ * tn_ * 4 if kt_ > 1 else 0)
                + 2 * tn_ * 4)

    while vmem_bytes(tm, tn, tk) > _VMEM_BUDGET and tk > _LANE:
        tk //= 2
    while vmem_bytes(tm, tn, tk) > _VMEM_BUDGET and tm > m_al:
        tm //= 2

    Mp = _round_up(B, tm)
    if (Mp, Kp) != (B, K):
        # Zero-pad: M for tile alignment, K so the contraction stays exact.
        x = jnp.pad(x, ((0, Mp - B), (0, Kp - K)))

    kt = Kp // tk
    gm, gn = Mp // tm, Np // tn

    cost = pl.CostEstimate(
        flops=2 * Mp * Kp * Np,
        transcendentals=0,
        bytes_accessed=int(x.size * in_itemsize
                           + wT.size * jnp.dtype(wT.dtype).itemsize
                           + Mp * Np * out_itemsize
                           + b2d.size * 4),
    )

    if kt == 1:
        # Full-K path: 2-D grid, no accumulator scratch, no init/store branches.
        out = pl.pallas_call(
            _linear_fullk_kernel,
            out_shape=jax.ShapeDtypeStruct((Mp, Np), out_dtype),
            grid_spec=pltpu.PrefetchScalarGridSpec(
                num_scalar_prefetch=0,
                grid=(gm, gn),
                in_specs=[
                    pl.BlockSpec((tm, Kp), lambda i, j: (i, 0)),   # x
                    pl.BlockSpec((Kp, tn), lambda i, j: (0, j)),   # weight (K, N)
                    pl.BlockSpec((1, tn), lambda i, j: (0, j)),    # bias (f32)
                ],
                out_specs=pl.BlockSpec((tm, tn), lambda i, j: (i, j)),
            ),
            compiler_params=pltpu.CompilerParams(
                dimension_semantics=("parallel", "parallel"),
                vmem_limit_bytes=_VMEM_LIMIT),
            cost_estimate=cost,
        )(x, wT, b2d)
    else:
        out = pl.pallas_call(
            _linear_ktiled_kernel,
            out_shape=jax.ShapeDtypeStruct((Mp, Np), out_dtype),
            grid_spec=pltpu.PrefetchScalarGridSpec(
                num_scalar_prefetch=0,
                grid=(gm, gn, kt),
                in_specs=[
                    pl.BlockSpec((tm, tk), lambda i, j, k: (i, k)),   # x
                    pl.BlockSpec((tk, tn), lambda i, j, k: (k, j)),   # weight (K, N)
                    pl.BlockSpec((1, tn), lambda i, j, k: (0, j)),    # bias, k-resident
                ],
                out_specs=pl.BlockSpec((tm, tn), lambda i, j, k: (i, j)),
                scratch_shapes=[pltpu.VMEM((tm, tn), jnp.float32)],
            ),
            compiler_params=pltpu.CompilerParams(
                dimension_semantics=("parallel", "parallel", "arbitrary"),
                vmem_limit_bytes=_VMEM_LIMIT),
            cost_estimate=cost,
        )(x, wT, b2d)

    return out[:B, :N]


def linear_fc(x, weight, bias, *, tm=512, tn=512, tk=1024, mxu_dtype=None):
    """Convenience wrapper: nn.Linear forward with PyTorch-layout weight
    (out_features, in_features).  In a serving loop, call prepare_linear_params
    once at load time and linear_fc_prepared per step instead."""
    wT, b2d, plan = prepare_linear_params(weight, bias, tn=tn, tk=tk,
                                          mxu_dtype=mxu_dtype)
    return linear_fc_prepared(x, wT, b2d, plan=plan, tm=tm, mxu_dtype=mxu_dtype)


if __name__ == "__main__":
    # Small shapes consistent with LinearFC(in_channels=32, out_channels=16).
    B, in_channels, out_channels = 8, 32, 16

    key = jax.random.PRNGKey(0)
    kx, kw, kb = jax.random.split(key, 3)

    # Deterministic init mimicking PyTorch's uniform(-1/sqrt(in), 1/sqrt(in)).
    bound = 1.0 / jnp.sqrt(jnp.float32(in_channels))
    weight = jax.random.uniform(kw, (out_channels, in_channels), jnp.float32,
                                minval=-bound, maxval=bound)
    bias = jax.random.uniform(kb, (out_channels,), jnp.float32,
                              minval=-bound, maxval=bound)
    x = jax.random.normal(kx, (B, in_channels), jnp.float32)

    # Reference (plain JAX nn.Linear semantics).
    y_ref = x @ weight.T + bias

    # f32 path: strict correctness check (matches the PyTorch module exactly).
    y = linear_fc(x, weight, bias)
    jax.block_until_ready(y)
    assert y.shape == (B, out_channels)
    assert jnp.allclose(y, y_ref, atol=1e-5, rtol=1e-5)

    # bf16-MXU path (recommended throughput default on v5e/v6e/v7x): weights
    # prepped ONCE, reused across calls; documented precision tradeoff.
    wT, b2d, plan = prepare_linear_params(weight, bias, mxu_dtype=jnp.bfloat16)
    y_bf16 = linear_fc_prepared(x, wT, b2d, plan=plan, mxu_dtype=jnp.bfloat16)
    jax.block_until_ready(y_bf16)
    assert y_bf16.shape == (B, out_channels)
    assert jnp.allclose(y_bf16, y_ref, atol=1e-1, rtol=1e-1)

    print("KERNEL_OK")
</pallas_src>

<mosaic_0001>
module attributes {stable_mosaic.version = 11 : i64} {
  func.func @_linear_fullk_kernel(%arg0: i32, %arg1: i32, %arg2: memref<8x128xf32, #tpu.memory_space<vmem>>, %arg3: memref<128x256xf32, #tpu.memory_space<vmem>>, %arg4: memref<1x256xf32, #tpu.memory_space<vmem>>, %arg5: memref<8x256xf32, #tpu.memory_space<vmem>>) attributes {dimension_semantics = [#tpu.dimension_semantics<parallel>, #tpu.dimension_semantics<parallel>], iteration_bounds = array<i64: 1, 1>, scalar_prefetch = 0 : i64, scratch_operands = 0 : i64, tpu.core_type = #tpu.core_type<tc>, window_params = [{transform_indices = @transform_0, window_bounds = array<i64: 8, 128>}, {transform_indices = @transform_1, window_bounds = array<i64: 128, 256>}, {transform_indices = @transform_2, window_bounds = array<i64: 1, 256>}, {transform_indices = @transform_3, window_bounds = array<i64: 8, 256>}]} {
    %c0 = arith.constant 0 : index
    %c0_0 = arith.constant 0 : index
    %0 = vector.load %arg2[%c0, %c0_0] : memref<8x128xf32, #tpu.memory_space<vmem>>, vector<8x128xf32>
    %c0_1 = arith.constant 0 : index
    %c0_2 = arith.constant 0 : index
    %1 = vector.load %arg3[%c0_1, %c0_2] : memref<128x256xf32, #tpu.memory_space<vmem>>, vector<128x256xf32>
    %cst = arith.constant dense<0.000000e+00> : vector<8x256xf32>
    %2 = tpu.matmul %0, %1, %cst {dimension_numbers = #tpu.dot_dimension_numbers<[1], [0], [0], [1], [0, 0, 1, 1], [], []>} : vector<8x128xf32>, vector<128x256xf32>, vector<8x256xf32> -> vector<8x256xf32>
    %c0_3 = arith.constant 0 : index
    %c0_4 = arith.constant 0 : index
    %3 = vector.load %arg4[%c0_3, %c0_4] : memref<1x256xf32, #tpu.memory_space<vmem>>, vector<1x256xf32>
    %4 = vector.broadcast %3 : vector<1x256xf32> to vector<8x256xf32>
    %5 = arith.addf %2, %4 : vector<8x256xf32>
    %c0_5 = arith.constant 0 : index
    %c0_6 = arith.constant 0 : index
    %6 = vector.load %arg5[%c0_5, %c0_6] : memref<8x256xf32, #tpu.memory_space<vmem>>, vector<8x256xf32>
    tpu.vector_store %arg5[%c0_5, %c0_6], %5 {strides = array<i32>} : memref<8x256xf32, #tpu.memory_space<vmem>>, vector<8x256xf32>,
    return
  }
  func.func @transform_0(%arg0: i32, %arg1: i32) -> (i32, i32) {
    %c0_i32 = arith.constant 0 : i32
    %c0_i32_0 = arith.constant 0 : i32
    return %arg0, %c0_i32 : i32, i32
  }
  func.func @transform_1(%arg0: i32, %arg1: i32) -> (i32, i32) {
    %c0_i32 = arith.constant 0 : i32
    %c0_i32_0 = arith.constant 0 : i32
    return %c0_i32, %arg1 : i32, i32
  }
  func.func @transform_2(%arg0: i32, %arg1: i32) -> (i32, i32) {
    %c0_i32 = arith.constant 0 : i32
    %c0_i32_0 = arith.constant 0 : i32
    return %c0_i32, %arg1 : i32, i32
  }
  func.func @transform_3(%arg0: i32, %arg1: i32) -> (i32, i32) {
    %c0_i32 = arith.constant 0 : i32
    return %arg0, %arg1 : i32, i32
  }
}

</mosaic_0001>

<bundles_post_ra>
// kernel: linear_fc_prepared.1
= control target key start
LH: loop header
LB: loop body
LE: loop exit
PB: predicated region body
PF: predicated region fallthrough
CT: control target
= control target key end

     0   :  { %8 = vsyncpa [#allocation3], 0  ;;  %s211_s12 = smov [#allocation2]   ;;  %s259_s0 = inlined_call_operand.vmem [shape: f32[8,128], index: 0, kind: input, shape index: {}]   ;;  %s260_s1 = inlined_call_operand.hbm [shape: f32[128,256], index: 1, kind: input, shape index: {}]   ;;  %s261_s2 = inlined_call_operand.vmem [shape: f32[1,256], index: 2, kind: input, shape index: {}]   ;;  %s262_s3 = inlined_call_operand.vmem [shape: f32[8,256], index: 3, kind: output, shape index: {}]  }
   0x1   :  { %s16_s13 = sshll.u32 %s211_s12, 4  ;;  %s187_s16 = scalar_lea.hbm %s260_s1, 4096  ;;  %s17_s13 = int_to_ptr.vmem [resolvable:$true] %s16_s13 }
   0x2   :  { %p188_p0 = scmp.ne.s32.totalorder %s260_s1, %s187_s16  ;;  %p191_p1 = scmp.lt.u32.totalorder %s187_s16, %s260_s1 }
   0x4   :  { %p193_p2 = pnand %p191_p1, %p188_p0 }
   0x6   :  { %196 = shalt.err (!%p193_p2)
}
   0x7   :  { %s197_s21 = scalar_lea.vmem %s17_s13, 4096  ;;  %p202_p4 = scmp.lt.s32.totalorder %s17_s13, %s17_s13 }
   0x8   :  { %p198_p3 = scmp.ne.s32.totalorder %s17_s13, %s197_s21  ;;  %p203_p5 = scmp.lt.s32.totalorder %s197_s21, %s197_s21 }
   0xa   :  { %p204_p6 = por %p203_p5, %p202_p4 }
   0xc   :  { %p205_p7 = pnand %p204_p6, %p198_p3 }
   0xe   :  { %208 = shalt.err (!%p205_p7)
}
   0xf   :  { %s212_s22 = smov 256   ;;  %s213_s23 = smov 16  }
  0x10   :  { %22 = dma.hbm_to_vmem [thread:$0]  %s260_s1, 4096, %s17_s13, [#allocation3], %s212_s22, %s212_s22, %s213_s23  }
  0x11   :  { %209 = dma.done.wait [#allocation3], 4096  }
  0x12   :  { %210 = vsyncadd [#allocation3], 4294963200  ;;  %v214_v0 = vmov 0.0   ;;  %v30_v1 = vld [vmem:[#allocation2 + $0x8] sm:$0xff]  ;;  %v32_v2 = vld [vmem:[#allocation2 + $0x18] sm:$0xff]  ;;  %v63_v50 = vlaneseq }
  0x13   :  { %137 = vmatprep.mubr.f32.mxu0 %v214_v0  ;;  %v29_v3 = vld [vmem:[#allocation2] sm:$0xff]  ;;  %v151_v4 = vpack.c.bf16 %v32_v2, %v30_v1  ;;  %v31_v5 = vld [vmem:[#allocation2 + $0x10] sm:$0xff]  ;;  %v34_v6 = vld [vmem:[#allocation2 + $0x28] sm:$0xff] }
  0x14   :  { %v36_v7 = vld [vmem:[#allocation2 + $0x38] sm:$0xff]  ;;  %v153_v8 = vpack.c.bf16 %v31_v5, %v29_v3  ;;  %v33_v10 = vld [vmem:[#allocation2 + $0x20] sm:$0xff]  ;;  %v35_v11 = vld [vmem:[#allocation2 + $0x30] sm:$0xff]  ;;  %v64_v51 = vshrl.u32 %v63_v50, 7 }
  0x15   :  { %v155_v9 = vpack.c.bf16 %v36_v7, %v34_v6  ;;  %v38_v12 = vld [vmem:[#allocation2 + $0x48] sm:$0xff]  ;;  %152 = vmatprep.subr.bf16.mxu0 %v151_v4  ;;  %v40_v13 = vld [vmem:[#allocation2 + $0x58] sm:$0xff]  ;;  %v157_v14 = vpack.c.bf16 %v35_v11, %v33_v10  ;;  %v37_v16 = vld [vmem:[#allocation2 + $0x40] sm:$0xff] }
  0x16   :  { %154 = vmatpush1.bf16.msra.mxu0 %v153_v8  ;;  %v159_v15 = vpack.c.bf16 %v40_v13, %v38_v12  ;;  %v39_v17 = vld [vmem:[#allocation2 + $0x50] sm:$0xff]  ;;  %v42_v18 = vld [vmem:[#allocation2 + $0x68] sm:$0xff]  ;;  %v44_v19 = vld [vmem:[#allocation2 + $0x78] sm:$0xff]  ;;  %v65_v52 = vsub.s32 0, %v64_v51  ;;  %v69_v54 = vsub.s32 1, %v64_v51 }
  0x17   :  { %156 = vmatprep.subr.bf16.mxu0 %v155_v9  ;;  %v161_v20 = vpack.c.bf16 %v39_v17, %v37_v16  ;;  %v163_v21 = vpack.c.bf16 %v44_v19, %v42_v18  ;;  %v41_v22 = vld [vmem:[#allocation2 + $0x60] sm:$0xff]  ;;  %v43_v23 = vld [vmem:[#allocation2 + $0x70] sm:$0xff]  ;;  %v46_v24 = vld [vmem:[#allocation2 + $0x88] sm:$0xff] }
  0x18   :  { %v48_v25 = vld [vmem:[#allocation2 + $0x98] sm:$0xff]  ;;  %v165_v26 = vpack.c.bf16 %v43_v23, %v41_v22  ;;  %v45_v28 = vld [vmem:[#allocation2 + $0x80] sm:$0xff]  ;;  %v47_v29 = vld [vmem:[#allocation2 + $0x90] sm:$0xff] }
  0x19   :  { %v167_v27 = vpack.c.bf16 %v48_v25, %v46_v24  ;;  %v50_v30 = vld [vmem:[#allocation2 + $0xa8] sm:$0xff]  ;;  %v52_v31 = vld [vmem:[#allocation2 + $0xb8] sm:$0xff]  ;;  %v169_v32 = vpack.c.bf16 %v47_v29, %v45_v28  ;;  %v49_v34 = vld [vmem:[#allocation2 + $0xa0] sm:$0xff] }
  0x1a   :  { %158 = vmatpush1.bf16.msra.mxu0 %v157_v14  ;;  %v171_v33 = vpack.c.bf16 %v52_v31, %v50_v30  ;;  %v51_v35 = vld [vmem:[#allocation2 + $0xb0] sm:$0xff]  ;;  %v54_v36 = vld [vmem:[#allocation2 + $0xc8] sm:$0xff]  ;;  %v56_v37 = vld [vmem:[#allocation2 + $0xd8] sm:$0xff] }
  0x1b   :  { %160 = vmatprep.subr.bf16.mxu0 %v159_v15  ;;  %v173_v38 = vpack.c.bf16 %v51_v35, %v49_v34  ;;  %v175_v39 = vpack.c.bf16 %v56_v37, %v54_v36  ;;  %v53_v40 = vld [vmem:[#allocation2 + $0xc0] sm:$0xff]  ;;  %v55_v41 = vld [vmem:[#allocation2 + $0xd0] sm:$0xff]  ;;  %v58_v42 = vld [vmem:[#allocation2 + $0xe8] sm:$0xff] }
  0x1c   :  { %v60_v43 = vld [vmem:[#allocation2 + $0xf8] sm:$0xff]  ;;  %v177_v44 = vpack.c.bf16 %v55_v41, %v53_v40  ;;  %v57_v46 = vld [vmem:[#allocation2 + $0xe0] sm:$0xff]  ;;  %v59_v47 = vld [vmem:[#allocation2 + $0xf0] sm:$0xff] }
  0x1d   :  { %v179_v45 = vpack.c.bf16 %v60_v43, %v58_v42  ;;  %v181_v48 = vpack.c.bf16 %v59_v47, %v57_v46  ;;  %v28_v49 = vld [vmem:[%s259_s0] sm:$0xff] }
  0x1e   :  { %162 = vmatpush1.bf16.msra.mxu0 %v161_v20  ;;  %v61_v53 = vld [vmem:[%s261_s2] sm:$0x3] }
  0x1f   :  { %164 = vmatprep.subr.bf16.mxu0 %v163_v21  ;;  %v66_v55 = vrot.slane %v61_v53, %v65_v52  ;;  %v70_v56 = vrot.slane %v61_v53, %v69_v54 }
  0x22   :  { %166 = vmatpush1.bf16.msra.mxu0 %v165_v26 }
  0x23   :  { %168 = vmatprep.subr.bf16.mxu0 %v167_v27 }
  0x26   :  { %170 = vmatpush1.bf16.msra.mxu0 %v169_v32 }
  0x27   :  { %172 = vmatprep.subr.bf16.mxu0 %v171_v33 }
  0x2a   :  { %174 = vmatpush1.bf16.msra.mxu0 %v173_v38 }
  0x2b   :  { %176 = vmatprep.subr.bf16.mxu0 %v175_v39 }
  0x2e   :  { %178 = vmatpush1.bf16.msra.mxu0 %v177_v44 }
  0x2f   :  { %180 = vmatprep.subr.bf16.mxu0 %v179_v45 }
  0x32   :  { %182 = vmatpush1.bf16.msra.mxu0 %v181_v48 }
  0x35   :  { %138 = vmatmul.mubr.f32.vlgmr.msra.gmra.mrb[0].mxu0 %v28_v49 }
 0x108   :  { %v139_v57 = vpop.f32.mrb[0].mxu0 }
 0x109   :  { %v140_v58 = vadd.f32 %v139_v57, %v66_v55  ;;  %v141_v59 = vpop.f32.mrb[1].mxu0 }
 0x10a   :  { %v142_v60 = vadd.f32 %v141_v59, %v70_v56 }
 0x10b   :  { %144 = vst [vmem:[%s262_s3] sm:$0xff] %v140_v58 }
 0x10c   :  { %145 = vst [vmem:[%s262_s3 + $0x8] sm:$0xff] %v142_v60 }
 0x10d   :  { %150 = vsyncpa [#allocation3], 1 }

</bundles_post_ra>
